<compile_context>
chip_gen: v5e
topology: v5e:2x2
jax: 0.10.0
libtpu: 0.0.40
codegen_flags: <defaults>
</compile_context>

<pallas_src>
import functools
import math

import jax
import jax.numpy as jnp
from jax import lax
from jax.experimental import pallas as pl
from jax.experimental.pallas import tpu as pltpu


def _pooled_reduce_kernel(src_ref, edit_ref, edit_out_ref, diff_out_ref,
                          edit_acc, diff_acc, *, chunk_lanes):
    """Streaming reduction over the lane (N) axis.

    Each grid step DMAs one (R, tile_n) lane-dense block of both videos and
    folds it into two tiny (R, 1) f32 accumulators (sum(edit), sum(|edit-src|))
    that stay resident in VMEM across the reduction ("arbitrary") axis.  The
    inner lane-chunk loop keeps the f32 intermediates (cast / sub / abs) at a
    small fixed vreg working set no matter how large the DMA tile is.
    """
    k = pl.program_id(1)

    @pl.when(k == 0)
    def _init():
        edit_acc[...] = jnp.zeros_like(edit_acc)
        diff_acc[...] = jnp.zeros_like(diff_acc)

    n_chunks = edit_ref.shape[-1] // chunk_lanes

    def body(c, carry):
        off = pl.multiple_of(c * chunk_lanes, chunk_lanes)
        s = src_ref[:, pl.ds(off, chunk_lanes)].astype(jnp.float32)
        e = edit_ref[:, pl.ds(off, chunk_lanes)].astype(jnp.float32)
        edit_acc[...] += jnp.sum(e, axis=-1, keepdims=True)
        diff_acc[...] += jnp.sum(jnp.abs(e - s), axis=-1, keepdims=True)
        return carry

    lax.fori_loop(0, n_chunks, body, 0)

    @pl.when(k == pl.num_programs(1) - 1)
    def _finalize():
        # Lane-dense (R, 128) per-split output block (every lane carries the sum).
        edit_out_ref[...] = jnp.broadcast_to(edit_acc[...], edit_out_ref.shape)
        diff_out_ref[...] = jnp.broadcast_to(diff_acc[...], diff_out_ref.shape)


def _score_heads(p_edit, p_diff, prompt_emb, params):
    """Tiny synthetic score heads (stand-ins for the three branches)."""
    # traditional branch (DOVER stand-in): linear head on pooled edit features.
    trad = jnp.mean(p_edit @ params["w_trad"]) + params["b_trad"][0, 0]
    # fidelity branch (DoubleStream stand-in): pooled edit + pooled |edit-src|.
    fid = jnp.mean(
        p_edit @ params["w_fid_e"] + p_diff @ params["w_fid_d"]
    ) + params["b_fid"][0, 0]
    # text branch (VideoTextAlignment stand-in): cosine(proj(video), prompt).
    proj = p_edit @ params["w_txt"]
    pr = prompt_emb.astype(jnp.float32)
    proj_n = proj * jax.lax.rsqrt(jnp.sum(proj * proj, -1, keepdims=True) + 1e-8)
    pr_n = pr * jax.lax.rsqrt(jnp.sum(pr * pr, -1, keepdims=True) + 1e-8)
    txt = jnp.mean(jnp.sum(proj_n * pr_n, -1))
    return trad + fid + txt


def _hw_config():
    """Return (scoped VMEM cap for this kernel, #TensorCores for the split)."""
    phys_vmem = None
    n_tc = None
    try:
        info = pltpu.get_tpu_info()
        phys_vmem = getattr(info, "vmem_capacity_bytes", None)
        for name in ("num_cores", "num_tensorcores", "tensorcores_per_chip",
                     "core_count"):
            v = getattr(info, name, None)
            if v:
                n_tc = int(v)
                break
    except Exception:
        pass
    kind = ""
    try:
        kind = jax.devices()[0].device_kind.lower()
    except Exception:
        pass
    if phys_vmem is None:
        # v7x has 64 MiB/TC; v5e/v6e have 128 MiB.  Unknown -> assume the small one.
        phys_vmem = (128 << 20) if ("v5" in kind or "v6" in kind) else (64 << 20)
    if n_tc is None:
        n_tc = 2 if ("v4" in kind or "v7" in kind) else 1
    # ~16 MiB headroom below physical VMEM; never ask for more than 96 MiB.
    vmem_cap = int(max(24 << 20, min(96 << 20, int(phys_vmem) - (16 << 20))))
    return vmem_cap, max(1, int(n_tc))


def _choose_fold(bc, n, itemsize):
    """Smallest F with (bc*F) a packed-sublane multiple and N % F == 0."""
    pack = max(1, 4 // itemsize) * 8      # 8 rows for f32, 16 for bf16
    f = pack // math.gcd(bc, pack)
    return f if (f > 1 and n % f == 0) else 1


def _choose_tile(nf, p, max_lanes, requested):
    """Largest 128-multiple lane tile within budget; prefer no-padding tiles."""
    gran = 128
    per_split = max(gran, nf // p)
    t_max = min(per_split, max_lanes)
    if requested is not None:
        t_max = min(t_max, requested)
    t_max = max(gran, (t_max // gran) * gran)
    t = t_max
    while t >= gran:
        if nf % (p * t) == 0:
            return t, nf
        t -= gran
    n_padded = -(-nf // (p * t_max)) * (p * t_max)
    return t_max, n_padded


def _choose_chunk(tile_n):
    for c in (2048, 1024, 512, 256, 128):
        if tile_n % c == 0:
            return min(c, tile_n)
    return 128


def eval_edit_model(src_video, edit_video, prompt_emb, params, *,
                    tile_n=None, num_splits=None):
    """src_video/edit_video: (B, C, T, H, W); prompt_emb: (B, D).

    Videos are streamed in their input dtype (pass bf16 for an HBM-bound ~2x);
    accumulation is always f32.  tile_n=None -> auto-size to the VMEM budget.
    """
    B, C, T, H, W = src_video.shape
    assert edit_video.shape == src_video.shape
    N = T * H * W
    BC = B * C
    itemsize = jnp.dtype(src_video.dtype).itemsize

    vmem_cap, n_tc = _hw_config()

    # Sublane folding: (BC, N) -> (BC*F, N/F) is a pure row-major metadata
    # reshape (no HBM traffic) that fills packed bf16/f32 sublanes for small BC.
    F = _choose_fold(BC, N, itemsize)
    R = BC * F
    Nf = N // F

    # Parallel split: one per TensorCore (v7x/v4: 2, v5e/v6e: 1).
    P = num_splits if num_splits is not None else n_tc
    P = max(1, min(int(P), 2))
    if Nf < P * 128:
        P = 1

    pack = max(1, 4 // itemsize) * 8
    r_pad = -(-R // pack) * pack
    # VMEM budget: 2 video inputs x 2 pipeline buffers per step, plus ~8 MiB
    # headroom for Mosaic internal scratch and the tiny accumulators/outputs.
    max_lanes = max(128, (vmem_cap - (8 << 20)) // (2 * 2 * r_pad * itemsize))
    tile, Np = _choose_tile(Nf, P, max_lanes, tile_n)
    assert tile % 128 == 0, "lane tile must be a multiple of 128"
    K = Np // (P * tile)
    chunk = _choose_chunk(tile)

    src2d = src_video.reshape(R, Nf)
    edit2d = edit_video.reshape(R, Nf)
    if Np != Nf:
        # TODO(synk): remainder tiles are zero-padded (zeros are neutral for both
        # sums); a BoundedSlice last tile would avoid this extra HBM pass.
        pad = Np - Nf
        src2d = jnp.pad(src2d, ((0, 0), (0, pad)))
        edit2d = jnp.pad(edit2d, ((0, 0), (0, pad)))

    vid_spec = pl.BlockSpec((R, tile), lambda p, k: (0, p * K + k))
    out_spec = pl.BlockSpec((R, 128), lambda p, k: (0, p))

    in_bytes = 2 * 2 * r_pad * tile * itemsize
    vmem_limit = int(min(vmem_cap, max(in_bytes + (6 << 20), 24 << 20)))

    cost = pl.CostEstimate(
        flops=4 * R * Np,
        transcendentals=0,
        bytes_accessed=2 * R * Np * itemsize + 2 * R * P * 128 * 4,
    )

    edit_out, diff_out = pl.pallas_call(
        functools.partial(_pooled_reduce_kernel, chunk_lanes=chunk),
        out_shape=(
            jax.ShapeDtypeStruct((R, P * 128), jnp.float32),
            jax.ShapeDtypeStruct((R, P * 128), jnp.float32),
        ),
        grid_spec=pltpu.PrefetchScalarGridSpec(
            num_scalar_prefetch=0,
            grid=(P, K),
            in_specs=[vid_spec, vid_spec],
            out_specs=[out_spec, out_spec],
            scratch_shapes=[pltpu.VMEM((R, 1), jnp.float32),
                            pltpu.VMEM((R, 1), jnp.float32)],
        ),
        compiler_params=pltpu.CompilerParams(
            dimension_semantics=("parallel", "arbitrary"),
            vmem_limit_bytes=vmem_limit),
        cost_estimate=cost,
    )(src2d, edit2d)

    # Tiny epilogue: combine per-split sums, un-fold rows, run the three
    # synthetic score heads (plain JAX; ~10^2 flops, irrelevant to perf).
    inv_n = 1.0 / N
    e_rows = edit_out.reshape(R, P, 128)[:, :, 0].sum(axis=1)
    d_rows = diff_out.reshape(R, P, 128)[:, :, 0].sum(axis=1)
    p_edit = (e_rows.reshape(BC, F).sum(axis=1) * inv_n).reshape(B, C)
    p_diff = (d_rows.reshape(BC, F).sum(axis=1) * inv_n).reshape(B, C)
    return _score_heads(p_edit, p_diff, prompt_emb, params)


def _reference(src_video, edit_video, prompt_emb, params):
    B, C = src_video.shape[:2]
    s = src_video.astype(jnp.float32).reshape(B, C, -1)
    e = edit_video.astype(jnp.float32).reshape(B, C, -1)
    p_edit = jnp.mean(e, axis=-1)
    p_diff = jnp.mean(jnp.abs(e - s), axis=-1)
    return _score_heads(p_edit, p_diff, prompt_emb, params)


if __name__ == "__main__":
    key = jax.random.PRNGKey(0)
    B, C, T, H, W, D = 2, 4, 4, 16, 16, 32
    ks = jax.random.split(key, 7)

    src_f32 = jax.random.normal(ks[0], (B, C, T, H, W), jnp.float32)
    edit_f32 = src_f32 + 0.1 * jax.random.normal(ks[1], (B, C, T, H, W),
                                                 jnp.float32)
    # Input pipeline delivers bf16 frames; the kernel streams them as-is and
    # accumulates in f32 (no wrapper-side cast = no extra HBM pass).
    src_video = src_f32.astype(jnp.bfloat16)
    edit_video = edit_f32.astype(jnp.bfloat16)
    prompt_emb = jax.random.normal(ks[2], (B, D), jnp.float32)

    params = {
        "w_trad": 0.1 * jax.random.normal(ks[3], (C, 1), jnp.float32),
        "b_trad": jnp.full((1, 1), 0.05, jnp.float32),
        "w_fid_e": 0.1 * jax.random.normal(ks[4], (C, 1), jnp.float32),
        "w_fid_d": 0.1 * jax.random.normal(ks[5], (C, 1), jnp.float32),
        "b_fid": jnp.full((1, 1), -0.02, jnp.float32),
        "w_txt": 0.1 * jax.random.normal(ks[6], (C, D), jnp.float32),
    }

    ref = jax.block_until_ready(
        _reference(src_video, edit_video, prompt_emb, params))

    # Small explicit tile_n forces a multi-step reduction grid so the resident
    # accumulator init/finalize path and the parallel split are exercised.
    score_small = jax.block_until_ready(
        jax.jit(functools.partial(eval_edit_model, tile_n=128))(
            src_video, edit_video, prompt_emb, params))
    assert jnp.allclose(score_small, ref, atol=1e-3, rtol=1e-3), (score_small, ref)

    # Production path: auto tile sizing against the generation-aware VMEM cap.
    score_auto = jax.block_until_ready(
        jax.jit(eval_edit_model)(src_video, edit_video, prompt_emb, params))
    assert jnp.allclose(score_auto, ref, atol=1e-3, rtol=1e-3), (score_auto, ref)

    _ = float(score_auto)  # `.item()` equivalent
    print("KERNEL_OK")
</pallas_src>

<mosaic_0001>
module attributes {stable_mosaic.version = 11 : i64} {
  func.func @_pooled_reduce_kernel(%arg0: i32, %arg1: i32, %arg2: memref<16x128xbf16, #tpu.memory_space<vmem>>, %arg3: memref<16x128xbf16, #tpu.memory_space<vmem>>, %arg4: memref<16x128xf32, #tpu.memory_space<vmem>>, %arg5: memref<16x128xf32, #tpu.memory_space<vmem>>, %arg6: memref<16x1xf32, #tpu.memory_space<vmem>>, %arg7: memref<16x1xf32, #tpu.memory_space<vmem>>) attributes {dimension_semantics = [#tpu.dimension_semantics<parallel>, #tpu.dimension_semantics<arbitrary>], iteration_bounds = array<i64: 1, 4>, scalar_prefetch = 0 : i64, scratch_operands = 2 : i64, tpu.core_type = #tpu.core_type<tc>, window_params = [{transform_indices = @transform_0, window_bounds = array<i64: 16, 128>}, {transform_indices = @transform_1, window_bounds = array<i64: 16, 128>}, {transform_indices = @transform_2, window_bounds = array<i64: 16, 128>}, {transform_indices = @transform_3, window_bounds = array<i64: 16, 128>}]} {
    %c0_i32 = arith.constant 0 : i32
    %0 = arith.cmpi eq, %arg1, %c0_i32 : i32
    %1 = arith.extui %0 : i1 to i32
    %c0_i32_0 = arith.constant 0 : i32
    %2 = arith.cmpi ne, %1, %c0_i32_0 : i32
    scf.if %2 {
      %cst_13 = arith.constant 0.000000e+00 : f32
      %26 = vector.broadcast %cst_13 : f32 to vector<16x1xf32>
      %c0_14 = arith.constant 0 : index
      %c0_15 = arith.constant 0 : index
      %27 = vector.load %arg6[%c0_14, %c0_15] : memref<16x1xf32, #tpu.memory_space<vmem>>, vector<16x1xf32>
      tpu.vector_store %arg6[%c0_14, %c0_15], %26 {strides = array<i32>} : memref<16x1xf32, #tpu.memory_space<vmem>>, vector<16x1xf32>,
      %cst_16 = arith.constant 0.000000e+00 : f32
      %28 = vector.broadcast %cst_16 : f32 to vector<16x1xf32>
      %c0_17 = arith.constant 0 : index
      %c0_18 = arith.constant 0 : index
      %29 = vector.load %arg7[%c0_17, %c0_18] : memref<16x1xf32, #tpu.memory_space<vmem>>, vector<16x1xf32>
      tpu.vector_store %arg7[%c0_17, %c0_18], %28 {strides = array<i32>} : memref<16x1xf32, #tpu.memory_space<vmem>>, vector<16x1xf32>,
    } else {
    }
    %c0_i32_1 = arith.constant 0 : i32
    %c128_i32 = arith.constant 128 : i32
    %3 = arith.muli %c0_i32_1, %c128_i32 : i32
    %4 = tpu.assume_multiple %3, 128 : i32
    %c0 = arith.constant 0 : index
    %5 = arith.index_cast %4 : i32 to index
    %6 = vector.load %arg2[%c0, %5] : memref<16x128xbf16, #tpu.memory_space<vmem>>, vector<16x128xbf16>
    %7 = arith.extf %6 : vector<16x128xbf16> to vector<16x128xf32>
    %c0_2 = arith.constant 0 : index
    %8 = arith.index_cast %4 : i32 to index
    %9 = vector.load %arg3[%c0_2, %8] : memref<16x128xbf16, #tpu.memory_space<vmem>>, vector<16x128xbf16>
    %10 = arith.extf %9 : vector<16x128xbf16> to vector<16x128xf32>
    %c0_3 = arith.constant 0 : index
    %c0_4 = arith.constant 0 : index
    %11 = vector.load %arg6[%c0_3, %c0_4] : memref<16x1xf32, #tpu.memory_space<vmem>>, vector<16x1xf32>
    %cst = arith.constant dense<0.000000e+00> : vector<16xf32>
    %12 = vector.multi_reduction <add>, %10, %cst [1] : vector<16x128xf32> to vector<16xf32>
    %13 = vector.shape_cast %12 : vector<16xf32> to vector<16x1xf32>
    %14 = arith.addf %11, %13 : vector<16x1xf32>
    %c0_5 = arith.constant 0 : index
    %c0_6 = arith.constant 0 : index
    %15 = vector.load %arg6[%c0_5, %c0_6] : memref<16x1xf32, #tpu.memory_space<vmem>>, vector<16x1xf32>
    tpu.vector_store %arg6[%c0_5, %c0_6], %14 {strides = array<i32>} : memref<16x1xf32, #tpu.memory_space<vmem>>, vector<16x1xf32>,
    %c0_7 = arith.constant 0 : index
    %c0_8 = arith.constant 0 : index
    %16 = vector.load %arg7[%c0_7, %c0_8] : memref<16x1xf32, #tpu.memory_space<vmem>>, vector<16x1xf32>
    %17 = arith.subf %10, %7 : vector<16x128xf32>
    %18 = math.absf %17 : vector<16x128xf32>
    %cst_9 = arith.constant dense<0.000000e+00> : vector<16xf32>
    %19 = vector.multi_reduction <add>, %18, %cst_9 [1] : vector<16x128xf32> to vector<16xf32>
    %20 = vector.shape_cast %19 : vector<16xf32> to vector<16x1xf32>
    %21 = arith.addf %16, %20 : vector<16x1xf32>
    %c0_10 = arith.constant 0 : index
    %c0_11 = arith.constant 0 : index
    %22 = vector.load %arg7[%c0_10, %c0_11] : memref<16x1xf32, #tpu.memory_space<vmem>>, vector<16x1xf32>
    tpu.vector_store %arg7[%c0_10, %c0_11], %21 {strides = array<i32>} : memref<16x1xf32, #tpu.memory_space<vmem>>, vector<16x1xf32>,
    %c1_i32 = arith.constant 1 : i32
    %c3_i32 = arith.constant 3 : i32
    %23 = arith.cmpi eq, %arg1, %c3_i32 : i32
    %24 = arith.extui %23 : i1 to i32
    %c0_i32_12 = arith.constant 0 : i32
    %25 = arith.cmpi ne, %24, %c0_i32_12 : i32
    scf.if %25 {
      %c0_13 = arith.constant 0 : index
      %c0_14 = arith.constant 0 : index
      %26 = vector.load %arg6[%c0_13, %c0_14] : memref<16x1xf32, #tpu.memory_space<vmem>>, vector<16x1xf32>
      %27 = vector.shape_cast %26 : vector<16x1xf32> to vector<16x1xf32>
      %28 = vector.broadcast %27 : vector<16x1xf32> to vector<16x128xf32>
      %c0_15 = arith.constant 0 : index
      %c0_16 = arith.constant 0 : index
      %29 = vector.load %arg4[%c0_15, %c0_16] : memref<16x128xf32, #tpu.memory_space<vmem>>, vector<16x128xf32>
      tpu.vector_store %arg4[%c0_15, %c0_16], %28 {strides = array<i32>} : memref<16x128xf32, #tpu.memory_space<vmem>>, vector<16x128xf32>,
      %c0_17 = arith.constant 0 : index
      %c0_18 = arith.constant 0 : index
      %30 = vector.load %arg7[%c0_17, %c0_18] : memref<16x1xf32, #tpu.memory_space<vmem>>, vector<16x1xf32>
      %31 = vector.shape_cast %30 : vector<16x1xf32> to vector<16x1xf32>
      %32 = vector.broadcast %31 : vector<16x1xf32> to vector<16x128xf32>
      %c0_19 = arith.constant 0 : index
      %c0_20 = arith.constant 0 : index
      %33 = vector.load %arg5[%c0_19, %c0_20] : memref<16x128xf32, #tpu.memory_space<vmem>>, vector<16x128xf32>
      tpu.vector_store %arg5[%c0_19, %c0_20], %32 {strides = array<i32>} : memref<16x128xf32, #tpu.memory_space<vmem>>, vector<16x128xf32>,
    } else {
    }
    return
  }
  func.func @transform_0(%arg0: i32, %arg1: i32) -> (i32, i32) {
    %c4_i32 = arith.constant 4 : i32
    %0 = arith.muli %arg0, %c4_i32 : i32
    %1 = arith.addi %0, %arg1 : i32
    %c0_i32 = arith.constant 0 : i32
    %c0_i32_0 = arith.constant 0 : i32
    return %c0_i32, %1 : i32, i32
  }
  func.func @transform_1(%arg0: i32, %arg1: i32) -> (i32, i32) {
    %c4_i32 = arith.constant 4 : i32
    %0 = arith.muli %arg0, %c4_i32 : i32
    %1 = arith.addi %0, %arg1 : i32
    %c0_i32 = arith.constant 0 : i32
    %c0_i32_0 = arith.constant 0 : i32
    return %c0_i32, %1 : i32, i32
  }
  func.func @transform_2(%arg0: i32, %arg1: i32) -> (i32, i32) {
    %c0_i32 = arith.constant 0 : i32
    %c0_i32_0 = arith.constant 0 : i32
    return %c0_i32, %arg0 : i32, i32
  }
  func.func @transform_3(%arg0: i32, %arg1: i32) -> (i32, i32) {
    %c0_i32 = arith.constant 0 : i32
    %c0_i32_0 = arith.constant 0 : i32
    return %c0_i32, %arg0 : i32, i32
  }
}

</mosaic_0001>

<bundles_post_ra>
// kernel: eval_edit_model.1
= control target key start
LH: loop header
LB: loop body
LE: loop exit
PB: predicated region body
PF: predicated region fallthrough
CT: control target
= control target key end

     0   :  { %s641_s12 = smov 0   ;;  %s643_s13 = smov 0   ;;  %s729_s0 = inlined_call_operand.vmem [shape: bf16[16,512], index: 0, kind: input, shape index: {}]   ;;  %s730_s1 = inlined_call_operand.vmem [shape: bf16[16,512], index: 1, kind: input, shape index: {}]   ;;  %s731_s2 = inlined_call_operand.vmem [shape: f32[16,128], index: 2, kind: output, shape index: {0}]   ;;  %s732_s3 = inlined_call_operand.vmem [shape: f32[16,128], index: 3, kind: output, shape index: {1}]  }
   0x1   :  { %s645_s14 = smov 0   ;;  %s647_s15 = smov 0  }
   0x2   :  { %s649_s16 = smov 0  }
   0x3 LB: > { %s23_s17 = sadd.s32 1, %s613_s15  ;;  %p44_p1 = scmp.ne.s32.totalorder %s605_s13, %s601_s12  ;;  %s617_s16 = sphi %s649_s16, %s14_s16   ;;  %s613_s15 = sphi %s647_s15, %s737_s15   ;;  %s609_s14 = sphi %s645_s14, %s736_s14   ;;  %s605_s13 = sphi %s643_s13, %s735_s13   ;;  %s601_s12 = sphi %s641_s12, %s734_s12  }
   0x4   : > { %p24_p0 = scmp.ge.s32.totalorder %s23_s17, 4  ;;  %p45_p2 = scmp.eq.s32.totalorder %s617_s16, 0 }
   0x5   : > { %s37_s20 = sadd.s32 1, %s605_s13  ;;  %p513_p5 = scmp.ge.s32.totalorder %s617_s16, 4 }
   0x6   : > { %s739_s17 = smov (%p24_p0, %s23_s17), 0  ;;  %p672_p3 = por %p45_p2, %p44_p1 }
   0x7   : > { %s34_s19 = ssub.s32 %s613_s15, %s739_s17  ;;  %152 = sbr.rel (%p513_p5) target bundleno = 24 (0x18), region = 16 }
   0x8   : > { %p35_p4 = scmp.eq.s32.totalorder %s34_s19, 0 }
   0xa   : > { %s680_s21 = scalar_select %p35_p4, %s605_s13, %s37_s20  }
   0xc   : > { %155 = sbr.rel (!%p672_p3) target bundleno = 18 (0x12), region = 20  ;;  %s157_s22 = sand.u32 (%p672_p3), 1, %s605_s13  }
   0xd   : > { %s515_s23 = sshll.u32 (%p672_p3), %s613_s15, 2  ;;  %s514_s24 = sshll.u32 (%p672_p3), %s157_s22, 3 }
   0xe   : > { %s163_s27 = scalar_lea.vmem (%p672_p3), %s729_s0, %s515_s23  ;;  %s159_s28 = scalar_lea.vmem (%p672_p3), [#allocation4], %s514_s24 }
   0xf   : > { %v180_v0 = vld [vmem:[%s163_s27] sm:$0xf] (%p672_p3)  ;;  %v182_v1 = vld [vmem:[%s163_s27 + $0x10] sm:$0xf] (%p672_p3) }
  0x10   : > { %181 = vst [vmem:[%s159_s28] sm:$0xf] (%p672_p3), %v180_v0 }
  0x11   : > { %183 = vst [vmem:[%s159_s28 + $0x4] sm:$0xf] %v182_v1 }
  0x12 PF: > { %211 = sbr.rel (!%p672_p3) target bundleno = 24 (0x18), region = 61  ;;  %s213_s29 = sand.u32 (%p672_p3), 1, %s605_s13  }
  0x13   : > { %s517_s30 = sshll.u32 (%p672_p3), %s613_s15, 2  ;;  %s516_s4 = sshll.u32 (%p672_p3), %s213_s29, 3 }
  0x14   : > { %s219_s7 = scalar_lea.vmem (%p672_p3), %s730_s1, %s517_s30  ;;  %s215_s8 = scalar_lea.vmem (%p672_p3), [#allocation5], %s516_s4 }
  0x15   : > { %v236_v2 = vld [vmem:[%s219_s7] sm:$0xf] (%p672_p3)  ;;  %v238_v3 = vld [vmem:[%s219_s7 + $0x10] sm:$0xf] (%p672_p3) }
  0x16   : > { %237 = vst [vmem:[%s215_s8] sm:$0xf] (%p672_p3), %v236_v2 }
  0x17   : > { %239 = vst [vmem:[%s215_s8 + $0x4] sm:$0xf] %v238_v3 }
  0x18 PF: > { %p518_p6 = scmp.ge.s32.totalorder %s617_s16, 1  ;;  %p266_p7 = scmp.lt.s32.totalorder %s617_s16, 5 }
  0x1a   : > { %p267_p8 = pnand %p518_p6, %p266_p7 }
  0x1b   : > { %s273_s9 = sand.u32 (!%p267_p8), 1, %s601_s12   ;;  %p521_p9 = scmp.ne.s32.totalorder (!%p267_p8), %s609_s14, 0 }
  0x1c   : > { %270 = sbr.rel (%p267_p8) target bundleno = 304 (0x130), region = 102  ;;  %s519_s10 = sshll.u32 (!%p267_p8), %s273_s9, 3 }
  0x1d   : > { %s275_s11 = scalar_lea.vmem (!%p267_p8), [#allocation4], %s519_s10  ;;  %s282_s18 = scalar_lea.vmem (!%p267_p8), [#allocation5], %s519_s10 }
  0x21   : > { %325 = sbr.rel (%p521_p9) target bundleno = 43 (0x2b), region = 114 }
  0x26   : > { %vm326_vm0 = vcmask 7168   ;;  %v619_v4 = vmov 0.0  }
  0x27   : > { %327 = vst.msk [vmem:[#allocation2] sm:$0xff] %vm326_vm0, %v619_v4 }
  0x28   : > { %328 = vst.msk [vmem:[#allocation2 + $0x8] sm:$0xff] %vm326_vm0, %v619_v4 }
  0x29   : > { %329 = vst.msk [vmem:[#allocation3] sm:$0xff] %vm326_vm0, %v619_v4 }
  0x2a   : > { %330 = vst.msk [vmem:[#allocation3 + $0x8] sm:$0xff] %vm326_vm0, %v619_v4 }
  0x2b PF: > { %v532_v5 = vld [vmem:[%s282_s18] sm:$0xff]   ;;  %v528_v6 = vld [vmem:[%s275_s11] sm:$0xff]   ;;  %vm347_vm1 = vcmask 7168   ;;  %p522_p10 = scmp.ne.s32.totalorder %s609_s14, 3 }
  0x2c   : > { %v533_v7 = vunpack.c.l.bf16 %v532_v5  ;;  %v529_v8 = vunpack.c.l.bf16 %v528_v6  ;;  %v534_v10 = vunpack.c.h.bf16 %v532_v5  ;;  %v530_v11 = vunpack.c.h.bf16 %v528_v6 }
  0x2e   : > { %341 = vadd.xlane.f32.xlu0 %v533_v7  ;;  %v352_v9 = vsub.f32 %v533_v7, %v529_v8  ;;  %v353_v13 = vsub.f32 %v534_v10, %v530_v11  ;;  %v339_v15 = vld [vmem:[#allocation2] sm:$0xff] }
  0x2f   : > { %v340_v21 = vld [vmem:[#allocation2 + $0x8] sm:$0xff] }
  0x30   : > { %v354_v12 = vand.u32 2147483647, %v352_v9  ;;  %v355_v14 = vand.u32 2147483647, %v353_v13  ;;  %v350_v18 = vld [vmem:[#allocation3] sm:$0xff] }
  0x31   : > { %v351_v24 = vld [vmem:[#allocation3 + $0x8] sm:$0xff] }
  0x32   : > { %356 = vadd.xlane.f32.xlu1 %v354_v12 }
  0x36   : > { %343 = vadd.xlane.f32.xlu0 %v534_v10 }
  0x3a   : > { %358 = vadd.xlane.f32.xlu1 %v355_v14 }
  0xa1   : > { %v342_v16 = vpop.xlane.xlu0 %341 }
  0xa2   : > { %v345_v17 = vadd.f32 %v342_v16, %v339_v15 }
  0xa4   : > { %348 = vst.msk [vmem:[#allocation2] sm:$0xff] %vm347_vm1, %v345_v17 }
  0xa5   : > { %v357_v19 = vpop.xlane.xlu1 %356 }
  0xa6   : > { %v360_v20 = vadd.f32 %v357_v19, %v350_v18 }
  0xa8   : > { %362 = vst.msk [vmem:[#allocation3] sm:$0xff] %vm347_vm1, %v360_v20 }
  0xa9   : > { %v344_v22 = vpop.xlane.xlu0 %343 }
  0xaa   : > { %v346_v23 = vadd.f32 %v344_v22, %v340_v21 }
  0xac   : > { %349 = vst.msk [vmem:[#allocation2 + $0x8] sm:$0xff] %vm347_vm1, %v346_v23  ;;  %367 = sbr.rel (%p522_p10) target bundleno = 304 (0x130), region = 118 }
  0xad   : > { %v359_v25 = vpop.xlane.xlu1 %358 }
  0xae   : > { %v361_v26 = vadd.f32 %v359_v25, %v351_v24 }
  0xb0   : > { %363 = vst.msk [vmem:[#allocation3 + $0x8] sm:$0xff] %vm347_vm1, %v361_v26 }
  0xb1   : > { %v382_v27 = vld [vmem:[#allocation3] sm:$0xff]  ;;  %v368_v28 = vld [vmem:[#allocation2] sm:$0xff]  ;;  %v620_v29 = vmov 0  }
  0xb2   : > { %578 = vset.pattern.permute.xlu1 %v620_v29  ;;  %577 = vset.pattern.permute.xlu0 %v620_v29 }
  0xb3   : > { %386 = vperm.xlu1 %578, %v382_v27   ;;  %372 = vperm.xlu0 %577, %v368_v28   ;;  %v369_v31 = vld [vmem:[#allocation2 + $0x8] sm:$0xff] }
  0xb7   : > { %v383_v30 = vld [vmem:[#allocation3 + $0x8] sm:$0xff] }
  0xbb   : > { %391 = vperm.xlu1 %578, %v383_v30   ;;  %377 = vperm.xlu0 %577, %v369_v31  }
 0x125   : > { %v387_v32 = vpop.permute.xlu1 %386  ;;  %v373_v33 = vpop.permute.xlu0 %372 }
 0x126   : > { %394 = vst [vmem:[%s732_s3] sm:$0xff] %v387_v32 }
 0x127   : > { %380 = vst [vmem:[%s731_s2] sm:$0xff] %v373_v33 }
 0x12d   : > { %v392_v34 = vpop.permute.xlu1 %391  ;;  %v378_v35 = vpop.permute.xlu0 %377 }
 0x12e   : > { %395 = vst [vmem:[%s732_s3 + $0x8] sm:$0xff] %v392_v34 }
 0x12f   : > { %381 = vst [vmem:[%s731_s2 + $0x8] sm:$0xff] %v378_v35 }
 0x130 PF: > { %s14_s16 = sadd.s32 1, %s617_s16   ;;  %s734_s12 = smov %s605_s13 }
 0x131   : > { %p11_p11 = scmp.ge.s32.totalorder %s14_s16, 6   ;;  %s735_s13 = smov %s680_s21 }
 0x132   : > { %s736_s14 = smov %s613_s15  ;;  %s737_s15 = smov %s739_s17 }
 0x133   :  { %13 = sbr.rel (!%p11_p11) target bundleno = 3 (0x3), region = 173 }

</bundles_post_ra>
